<compile_context>
chip_gen: v5e
topology: v5e:2x2
jax: 0.10.0
libtpu: 0.0.40
codegen_flags: <defaults>
</compile_context>

<pallas_src>
import math
import functools

import jax
import jax.numpy as jnp
from jax.experimental import pallas as pl
from jax.experimental.pallas import tpu as pltpu


def _cdiv(a, b):
    return -(-a // b)


def _round_up(a, m):
    return ((a + m - 1) // m) * m


def _vmem_budget_bytes():
    """~80% of this generation's VMEM (128 MiB v5e/v6e, 64 MiB v7x)."""
    try:
        cap = int(pltpu.get_tpu_info().vmem_capacity_bytes)
    except Exception:
        cap = 64 << 20  # conservative fallback (v7x per-core), safe everywhere
    return (cap * 4) // 5


def _ln_relu(y, g, beta, eps):
    # Shifted two-pass LayerNorm statistics: y stays VMEM/register-resident, so the
    # second reduction over (y - mean) is cheap and avoids E[y^2]-mean^2 cancellation.
    mean = jnp.mean(y, axis=-1, keepdims=True)
    d = y - mean
    var = jnp.mean(d * d, axis=-1, keepdims=True)
    inv = jax.lax.rsqrt(var + eps)
    return jnp.maximum(d * inv * g + beta, 0.0)


def _kernel_single(x_ref, w_ref, b_ref, g_ref, beta_ref, o_ref, *, eps, matmul_dtype):
    # grid = (grid_m,): whole K resident; weight index map is constant -> one DMA.
    x = x_ref[...]
    if x.dtype != matmul_dtype:
        x = x.astype(matmul_dtype)  # bf16 MXU inputs, f32 accumulate
    y = jnp.dot(x, w_ref[...], preferred_element_type=jnp.float32) + b_ref[...]
    o_ref[...] = _ln_relu(y, g_ref[...], beta_ref[...], eps).astype(o_ref.dtype)


def _kernel_ktiled(x_ref, w_ref, b_ref, g_ref, beta_ref, o_ref, *scratch,
                   eps, matmul_dtype):
    # grid = (grid_m, grid_k), K innermost ("arbitrary").  When the output dtype is
    # f32 the output block itself (resident across K: its index map ignores k) is
    # the accumulator and no scratch is allocated.
    acc_ref = scratch[0] if scratch else o_ref
    k = pl.program_id(1)

    @pl.when(k == 0)
    def _init():
        # Fold the bias into the accumulator init (removes one epilogue VPU add).
        acc_ref[...] = jnp.broadcast_to(b_ref[...], acc_ref.shape).astype(acc_ref.dtype)

    x = x_ref[...]
    if x.dtype != matmul_dtype:
        x = x.astype(matmul_dtype)
    acc_ref[...] += jnp.dot(x, w_ref[...], preferred_element_type=jnp.float32)

    @pl.when(k == pl.num_programs(1) - 1)
    def _epilogue():
        o_ref[...] = _ln_relu(acc_ref[...], g_ref[...], beta_ref[...],
                              eps).astype(o_ref.dtype)


def linear_block(x, w_t, b, gamma, beta, *, eps=1e-5, out_dtype=None,
                 matmul_dtype=jnp.bfloat16):
    """x: (..., K); w_t: (K, N); b, gamma, beta: (N,). Returns (..., N)."""
    orig_shape = x.shape
    K = orig_shape[-1]
    N = w_t.shape[1]
    rows = int(math.prod(orig_shape[:-1])) if len(orig_shape) > 1 else 1
    out_dtype = jnp.dtype(out_dtype) if out_dtype is not None else jnp.dtype(x.dtype)

    x2 = x.reshape(rows, K)                      # no wrapper-side dtype cast of x
    w2 = w_t.astype(matmul_dtype)                # halve weight DMA traffic
    b2 = b.reshape(1, N).astype(jnp.float32)
    g2 = gamma.reshape(1, N).astype(jnp.float32)
    beta2 = beta.reshape(1, N).astype(jnp.float32)

    x_bytes = jnp.dtype(x.dtype).itemsize
    w_bytes = jnp.dtype(matmul_dtype).itemsize
    o_bytes = out_dtype.itemsize
    budget = _vmem_budget_bytes()

    # ---- M tile: big for MXU utilization, but keep >= 2 blocks when rows > 256
    # so the "parallel" M axis splits across both v7x TensorCores. --------------
    if rows <= 256:
        tm = rows                                # full-dim block: always legal
    else:
        tm = min(512, _round_up(_cdiv(rows, 2), 128))

    def _fits(tm_, tk_, with_scratch):
        est = (2 * tm_ * tk_ * x_bytes + 2 * tk_ * N * w_bytes
               + 2 * tm_ * N * o_bytes + 6 * N * 4)
        if with_scratch:
            est += tm_ * N * 4
        return est <= budget

    # ---- K handling -----------------------------------------------------------
    single_pass = _fits(tm, K, False)
    if single_pass:
        tk = K
        grid = (_cdiv(rows, tm),)
    else:
        need_scratch = (out_dtype != jnp.float32)
        k_pad = _round_up(K, 128)
        tk = 128
        for cand in (512, 384, 256):             # largest aligned tile that fits
            if k_pad % cand == 0 and _fits(tm, cand, need_scratch):
                tk = cand
                break
        while tm > 128 and not _fits(tm, tk, need_scratch):
            tm = max(128, tm // 2)               # wide-N pressure (v7x 64 MiB)
        if k_pad != K:
            # Zero-pad the reduction dim once: zero cols/rows contribute nothing.
            x2 = jnp.pad(x2, ((0, 0), (0, k_pad - K)))
            w2 = jnp.pad(w2, ((0, k_pad - K), (0, 0)))
        grid = (_cdiv(rows, tm), k_pad // tk)

    # ---- VMEM limit sized from the actual footprint, capped at the per-gen budget.
    est = (2 * tm * tk * x_bytes + 2 * tk * N * w_bytes
           + 2 * tm * N * o_bytes + 6 * N * 4)
    if (not single_pass) and out_dtype != jnp.float32:
        est += tm * N * 4
    vmem_limit = int(min(max(est * 5 // 4 + (2 << 20), 32 << 20), budget))

    if single_pass:
        in_specs = [
            pl.BlockSpec((tm, K), lambda i: (i, 0)),
            pl.BlockSpec((K, N), lambda i: (0, 0)),   # constant -> DMA'd once
            pl.BlockSpec((1, N), lambda i: (0, 0)),
            pl.BlockSpec((1, N), lambda i: (0, 0)),
            pl.BlockSpec((1, N), lambda i: (0, 0)),
        ]
        out_specs = pl.BlockSpec((tm, N), lambda i: (i, 0))
        scratch_shapes = []
        kernel = functools.partial(_kernel_single, eps=eps, matmul_dtype=matmul_dtype)
        dim_sem = ("parallel",)
    else:
        in_specs = [
            pl.BlockSpec((tm, tk), lambda i, k: (i, k)),
            pl.BlockSpec((tk, N), lambda i, k: (k, 0)),
            pl.BlockSpec((1, N), lambda i, k: (0, 0)),
            pl.BlockSpec((1, N), lambda i, k: (0, 0)),
            pl.BlockSpec((1, N), lambda i, k: (0, 0)),
        ]
        out_specs = pl.BlockSpec((tm, N), lambda i, k: (i, 0))
        scratch_shapes = ([] if out_dtype == jnp.float32
                          else [pltpu.VMEM((tm, N), jnp.float32)])
        kernel = functools.partial(_kernel_ktiled, eps=eps, matmul_dtype=matmul_dtype)
        dim_sem = ("parallel", "arbitrary")

    out = pl.pallas_call(
        kernel,
        out_shape=jax.ShapeDtypeStruct((rows, N), out_dtype),
        grid_spec=pltpu.PrefetchScalarGridSpec(
            num_scalar_prefetch=0,
            grid=grid,
            in_specs=in_specs,
            out_specs=out_specs,
            scratch_shapes=scratch_shapes,
        ),
        compiler_params=pltpu.CompilerParams(
            dimension_semantics=dim_sem,
            vmem_limit_bytes=vmem_limit,
        ),
    )(x2, w2, b2, g2, beta2)

    return out.reshape(orig_shape[:-1] + (N,))


def init_params(key, in_features, out_features):
    """Deterministic parameter init matching LinearBlock.__init__ semantics."""
    k_w, k_b = jax.random.split(key)
    # fc.weight ~ N(0, sqrt(2/out_features)); stored transposed [in, out].
    w = jax.random.normal(k_w, (out_features, in_features), jnp.float32) * math.sqrt(
        2.0 / out_features)
    w_t = w.T
    # fc.bias: PyTorch Linear default U(-1/sqrt(in), 1/sqrt(in)) (not overridden).
    bound = 1.0 / math.sqrt(in_features)
    b = jax.random.uniform(k_b, (out_features,), jnp.float32, -bound, bound)
    # LayerNorm: weight=1, bias=0 (explicitly set in __init__).
    gamma = jnp.ones((out_features,), jnp.float32)
    beta = jnp.zeros((out_features,), jnp.float32)
    return w_t, b, gamma, beta


def _reference(x, w_t, b, gamma, beta, eps=1e-5):
    # Plain-JAX reference with the same bf16-input / f32-accumulate matmul path.
    # Dropout(p=0.0) is the identity.
    y = jnp.dot(x.astype(jnp.bfloat16), w_t.astype(jnp.bfloat16),
                preferred_element_type=jnp.float32) + b
    mean = jnp.mean(y, axis=-1, keepdims=True)
    var = jnp.mean((y - mean) ** 2, axis=-1, keepdims=True)
    return jnp.maximum((y - mean) * jax.lax.rsqrt(var + eps) * gamma + beta, 0.0)


if __name__ == "__main__":
    key = jax.random.PRNGKey(0)
    k_x, k_p = jax.random.split(key)

    batch, seq, in_features, out_features = 2, 8, 32, 32
    x = jax.random.normal(k_x, (batch, seq, in_features), jnp.float32)
    w_t, b, gamma, beta = init_params(k_p, in_features, out_features)

    out = jax.block_until_ready(linear_block(x, w_t, b, gamma, beta))
    ref = _reference(x, w_t, b, gamma, beta)
    assert out.shape == (batch, seq, out_features)
    assert jnp.allclose(out, ref, atol=2e-3, rtol=2e-3), float(
        jnp.max(jnp.abs(out - ref)))

    # Second small case: rows > 256 exercises grid_m >= 2 and the masked M edge
    # block (300 = 256 + 44 valid rows in the last block).
    x_big = jax.random.normal(k_x, (1, 300, in_features), jnp.float32)
    out_big = jax.block_until_ready(linear_block(x_big, w_t, b, gamma, beta))
    ref_big = _reference(x_big, w_t, b, gamma, beta)
    assert out_big.shape == (1, 300, out_features)
    assert jnp.allclose(out_big, ref_big, atol=2e-3, rtol=2e-3), float(
        jnp.max(jnp.abs(out_big - ref_big)))

    print("KERNEL_OK")
</pallas_src>

<mosaic_0001>
module attributes {stable_mosaic.version = 11 : i64} {
  func.func @_kernel_single(%arg0: i32, %arg1: memref<16x32xf32, #tpu.memory_space<vmem>>, %arg2: memref<32x32xbf16, #tpu.memory_space<vmem>>, %arg3: memref<1x32xf32, #tpu.memory_space<vmem>>, %arg4: memref<1x32xf32, #tpu.memory_space<vmem>>, %arg5: memref<1x32xf32, #tpu.memory_space<vmem>>, %arg6: memref<16x32xf32, #tpu.memory_space<vmem>>) attributes {dimension_semantics = [#tpu.dimension_semantics<parallel>], iteration_bounds = array<i64: 1>, scalar_prefetch = 0 : i64, scratch_operands = 0 : i64, tpu.core_type = #tpu.core_type<tc>, window_params = [{transform_indices = @transform_0, window_bounds = array<i64: 16, 32>}, {pipeline_mode = #tpu.pipeline_mode<synchronous>, transform_indices = @transform_1, window_bounds = array<i64: 32, 32>}, {pipeline_mode = #tpu.pipeline_mode<synchronous>, transform_indices = @transform_2, window_bounds = array<i64: 1, 32>}, {pipeline_mode = #tpu.pipeline_mode<synchronous>, transform_indices = @transform_3, window_bounds = array<i64: 1, 32>}, {pipeline_mode = #tpu.pipeline_mode<synchronous>, transform_indices = @transform_4, window_bounds = array<i64: 1, 32>}, {transform_indices = @transform_5, window_bounds = array<i64: 16, 32>}]} {
    %c0 = arith.constant 0 : index
    %c0_0 = arith.constant 0 : index
    %0 = vector.load %arg1[%c0, %c0_0] : memref<16x32xf32, #tpu.memory_space<vmem>>, vector<16x32xf32>
    %1 = arith.truncf %0 : vector<16x32xf32> to vector<16x32xbf16>
    %c0_1 = arith.constant 0 : index
    %c0_2 = arith.constant 0 : index
    %2 = vector.load %arg2[%c0_1, %c0_2] : memref<32x32xbf16, #tpu.memory_space<vmem>>, vector<32x32xbf16>
    %cst = arith.constant dense<0.000000e+00> : vector<16x32xf32>
    %3 = tpu.matmul %1, %2, %cst {dimension_numbers = #tpu.dot_dimension_numbers<[1], [0], [0], [1], [0, 0, 1, 1], [], []>} : vector<16x32xbf16>, vector<32x32xbf16>, vector<16x32xf32> -> vector<16x32xf32>
    %c0_3 = arith.constant 0 : index
    %c0_4 = arith.constant 0 : index
    %4 = vector.load %arg3[%c0_3, %c0_4] : memref<1x32xf32, #tpu.memory_space<vmem>>, vector<1x32xf32>
    %5 = vector.broadcast %4 : vector<1x32xf32> to vector<16x32xf32>
    %6 = arith.addf %3, %5 : vector<16x32xf32>
    %c0_5 = arith.constant 0 : index
    %c0_6 = arith.constant 0 : index
    %7 = vector.load %arg4[%c0_5, %c0_6] : memref<1x32xf32, #tpu.memory_space<vmem>>, vector<1x32xf32>
    %c0_7 = arith.constant 0 : index
    %c0_8 = arith.constant 0 : index
    %8 = vector.load %arg5[%c0_7, %c0_8] : memref<1x32xf32, #tpu.memory_space<vmem>>, vector<1x32xf32>
    %cst_9 = arith.constant dense<0.000000e+00> : vector<16xf32>
    %9 = vector.multi_reduction <add>, %6, %cst_9 [1] : vector<16x32xf32> to vector<16xf32>
    %10 = vector.shape_cast %9 : vector<16xf32> to vector<16x1xf32>
    %cst_10 = arith.constant 3.200000e+01 : f32
    %11 = vector.broadcast %cst_10 : f32 to vector<16x1xf32>
    %12 = arith.divf %10, %11 : vector<16x1xf32>
    %13 = vector.broadcast %12 : vector<16x1xf32> to vector<16x32xf32>
    %14 = arith.subf %6, %13 : vector<16x32xf32>
    %15 = arith.mulf %14, %14 : vector<16x32xf32>
    %cst_11 = arith.constant dense<0.000000e+00> : vector<16xf32>
    %16 = vector.multi_reduction <add>, %15, %cst_11 [1] : vector<16x32xf32> to vector<16xf32>
    %17 = vector.shape_cast %16 : vector<16xf32> to vector<16x1xf32>
    %cst_12 = arith.constant 3.200000e+01 : f32
    %18 = vector.broadcast %cst_12 : f32 to vector<16x1xf32>
    %19 = arith.divf %17, %18 : vector<16x1xf32>
    %cst_13 = arith.constant 9.99999974E-6 : f32
    %20 = vector.broadcast %cst_13 : f32 to vector<16x1xf32>
    %21 = arith.addf %19, %20 : vector<16x1xf32>
    %22 = math.rsqrt %21 : vector<16x1xf32>
    %23 = vector.broadcast %22 : vector<16x1xf32> to vector<16x32xf32>
    %24 = arith.mulf %14, %23 : vector<16x32xf32>
    %25 = vector.broadcast %7 : vector<1x32xf32> to vector<16x32xf32>
    %26 = arith.mulf %24, %25 : vector<16x32xf32>
    %27 = vector.broadcast %8 : vector<1x32xf32> to vector<16x32xf32>
    %28 = arith.addf %26, %27 : vector<16x32xf32>
    %cst_14 = arith.constant 0.000000e+00 : f32
    %29 = vector.broadcast %cst_14 : f32 to vector<16x32xf32>
    %30 = arith.maximumf %28, %29 : vector<16x32xf32>
    %c0_15 = arith.constant 0 : index
    %c0_16 = arith.constant 0 : index
    %31 = vector.load %arg6[%c0_15, %c0_16] : memref<16x32xf32, #tpu.memory_space<vmem>>, vector<16x32xf32>
    tpu.vector_store %arg6[%c0_15, %c0_16], %30 {strides = array<i32>} : memref<16x32xf32, #tpu.memory_space<vmem>>, vector<16x32xf32>,
    return
  }
  func.func @transform_0(%arg0: i32) -> (i32, i32) {
    %c0_i32 = arith.constant 0 : i32
    %c0_i32_0 = arith.constant 0 : i32
    return %arg0, %c0_i32 : i32, i32
  }
  func.func @transform_1(%arg0: i32) -> (i32, i32) {
    %c0_i32 = arith.constant 0 : i32
    %c0_i32_0 = arith.constant 0 : i32
    %c0_i32_1 = arith.constant 0 : i32
    return %c0_i32, %c0_i32_0 : i32, i32
  }
  func.func @transform_2(%arg0: i32) -> (i32, i32) {
    %c0_i32 = arith.constant 0 : i32
    %c0_i32_0 = arith.constant 0 : i32
    %c0_i32_1 = arith.constant 0 : i32
    return %c0_i32, %c0_i32_0 : i32, i32
  }
  func.func @transform_3(%arg0: i32) -> (i32, i32) {
    %c0_i32 = arith.constant 0 : i32
    %c0_i32_0 = arith.constant 0 : i32
    %c0_i32_1 = arith.constant 0 : i32
    return %c0_i32, %c0_i32_0 : i32, i32
  }
  func.func @transform_4(%arg0: i32) -> (i32, i32) {
    %c0_i32 = arith.constant 0 : i32
    %c0_i32_0 = arith.constant 0 : i32
    %c0_i32_1 = arith.constant 0 : i32
    return %c0_i32, %c0_i32_0 : i32, i32
  }
  func.func @transform_5(%arg0: i32) -> (i32, i32) {
    %c0_i32 = arith.constant 0 : i32
    %c0_i32_0 = arith.constant 0 : i32
    return %arg0, %c0_i32 : i32, i32
  }
}

</mosaic_0001>

<bundles_post_ra>
// kernel: tpu_custom_call.1
= control target key start
LH: loop header
LB: loop body
LE: loop exit
PB: predicated region body
PF: predicated region fallthrough
CT: control target
= control target key end

     0   :  { %10 = vsyncpa [#allocation3], 0  ;;  %s357_s0 = inlined_call_operand.hbm [shape: f32[16,32], index: 0, kind: input, shape index: {}]   ;;  %s358_s1 = inlined_call_operand.hbm [shape: bf16[32,32], index: 1, kind: input, shape index: {}]   ;;  %s359_s2 = inlined_call_operand.vmem [shape: f32[1,32], index: 2, kind: input, shape index: {}]   ;;  %s360_s3 = inlined_call_operand.vmem [shape: f32[1,32], index: 3, kind: input, shape index: {}]   ;;  %s361_s4 = inlined_call_operand.vmem [shape: f32[1,32], index: 4, kind: input, shape index: {}]   ;;  %s362_s5 = inlined_call_operand.hbm [shape: f32[16,32], index: 5, kind: output, shape index: {}]  }
   0x1   :  { %11 = vsyncpa [#allocation6], 0 }
   0x2   :  { %12 = vsyncpa [#allocation4], 0  ;;  %s17_s20 = sshll.u32 %s357_s0, 4  ;;  %s288_s21 = smov [#allocation2]   ;;  %s18_s20 = int_to_ptr.hbm [resolvable:$true] %s17_s20 }
   0x3   :  { %s19_s22 = sshll.u32 %s288_s21, 4  ;;  %s30_s25 = sshll.u32 %s358_s1, 4  ;;  %s20_s22 = int_to_ptr.vmem [resolvable:$true] %s19_s22  ;;  %s31_s25 = int_to_ptr.hbm [resolvable:$true] %s30_s25 }
   0x4   :  { %s289_s26 = smov 128   ;;  %s290_s27 = smov 8  }
   0x5   :  { %25 = dma.hbm_to_vmem [thread:$0]  %s18_s20, 256, %s20_s22, [#allocation3], %s289_s26, %s289_s26, %s290_s27  }
   0x6   :  { %s291_s28 = smov [#allocation5]   ;;  %s292_s30 = smov 64  }
   0x7   :  { %s32_s29 = sshll.u32 %s291_s28, 4  ;;  %s293_s0 = smov 4   ;;  %s33_s29 = int_to_ptr.vmem [resolvable:$true] %s32_s29 }
   0x8   :  { %38 = dma.hbm_to_vmem [thread:$0]  %s31_s25, 256, %s33_s29, [#allocation6], %s292_s30, %s292_s30, %s293_s0  }
   0x9   :  { %282 = dma.done.wait [#allocation3], 256  }
   0xa   :  { %283 = vsyncadd [#allocation3], 4294967040 }
   0xb   :  { %284 = dma.done.wait [#allocation6], 256  }
   0xc   :  { %285 = vsyncadd [#allocation6], 4294967040  ;;  %v192_v0 = vld [vmem:[#allocation5 + $0x8] sm:$0xff]  ;;  %v191_v1 = vld [vmem:[#allocation5] sm:$0xff]  ;;  %vm77_vm0 = vcmask 261120   ;;  %v294_v12 = vmov 32.0  }
   0xd   :  { %v54_v2 = vld [vmem:[#allocation2] sm:$0xff]  ;;  %87 = vmatpush.bf16.msra.mxu0 %v192_v0  ;;  %v55_v3 = vld [vmem:[#allocation2 + $0x8] sm:$0xff]  ;;  %204 = vrcp.f32 %v294_v12 }
   0xe   :  { %v56_v4 = vpack.c.bf16 %v55_v3, %v54_v2  ;;  %v201_v5 = vld [vmem:[%s359_s2] ss:$0 sm:$0xff] }
   0xf   :  { %v202_v43 = vld [vmem:[%s360_s3] ss:$0 sm:$0xff]  ;;  %s295_s3 = smov [#allocation7]  }
  0x10   :  { %v203_v47 = vld [vmem:[%s361_s4] ss:$0 sm:$0xff]  ;;  %s166_s10 = sshll.u32 %s295_s3, 4  ;;  %s168_s4 = sshll.u32 %s362_s5, 4  ;;  %s167_s10 = int_to_ptr.vmem [resolvable:$true] %s166_s10  ;;  %s169_s4 = int_to_ptr.hbm [resolvable:$true] %s168_s4 }
  0x11   :  { %88 = vmatpush.bf16.msra.mxu0 %v191_v1 }
  0x13   :  { %v205_v13 = vpop.eup %204 }
  0x14   :  { %190 = vmatmul.msk.bf16.vlgmr.msra.gmra.mxu0 %vm77_vm0, %v56_v4  ;;  %v104_v14 = vmul.f32 32.0, %v205_v13  ;;  %vm108_vm1 = vweird.f32 %v205_v13 }
  0x16   :  { %v105_v15 = vsub.f32 1.0, %v104_v14 }
  0x18   :  { %v106_v16 = vmul.f32 %v205_v13, %v105_v15 }
  0x1a   :  { %v107_v17 = vadd.f32 %v205_v13, %v106_v16 }
  0x1c   :  { %v109_v18 = vsel %vm108_vm1, %v205_v13, %v107_v17 }
  0x91   :  { %v90_v6 = vpop.f32.mrf.mxu0 }
  0x92   :  { %v91_v7 = vadd.f32 %v201_v5, %v90_v6 }
  0x94   :  { %v97_v8 = vsel %vm77_vm0, %v91_v7, 0.0 }
  0x95   :  { %98 = vadd.xlane.f32.xlu0 %v97_v8 }
  0x99   :  { %v92_v9 = vpop.f32.mrf.mxu0 }
  0x9a   :  { %v93_v10 = vadd.f32 %v201_v5, %v92_v9 }
  0x9c   :  { %v100_v11 = vsel %vm77_vm0, %v93_v10, 0.0 }
  0x9d   :  { %101 = vadd.xlane.f32.xlu0 %v100_v11 }
 0x108   :  { %v99_v19 = vpop.xlane.xlu0 %98 }
 0x109   :  { %v110_v20 = vmul.f32 %v109_v18, %v99_v19 }
 0x10b   :  { %v112_v21 = vsub.f32 %v91_v7, %v110_v20 }
 0x10d   :  { %v114_v22 = vmul.f32 %v112_v21, %v112_v21 }
 0x10f   :  { %v116_v23 = vsel %vm77_vm0, %v114_v22, 0.0 }
 0x110   :  { %117 = vadd.xlane.f32.xlu1 %v116_v23  ;;  %v102_v24 = vpop.xlane.xlu0 %101 }
 0x111   :  { %v111_v25 = vmul.f32 %v109_v18, %v102_v24 }
 0x113   :  { %v113_v26 = vsub.f32 %v93_v10, %v111_v25 }
 0x115   :  { %v115_v27 = vmul.f32 %v113_v26, %v113_v26 }
 0x117   :  { %v119_v28 = vsel %vm77_vm0, %v115_v27, 0.0 }
 0x118   :  { %120 = vadd.xlane.f32.xlu1 %v119_v28 }
 0x183   :  { %v118_v29 = vpop.xlane.xlu1 %117 }
 0x184   :  { %v122_v30 = vmul.f32 %v118_v29, %v109_v18 }
 0x186   :  { %v124_v31 = vadd.f32 1e-05, %v122_v30 }
 0x188   :  { %206 = vrsqrt.f32 %v124_v31  ;;  %vm132_vm3 = vweird.f32 %v124_v31 }
 0x18b   :  { %v121_v32 = vpop.xlane.xlu1 %120 }
 0x18c   :  { %v123_v33 = vmul.f32 %v121_v32, %v109_v18 }
 0x18e   :  { %v207_v34 = vpop.eup %206  ;;  %v125_v35 = vadd.f32 1e-05, %v123_v33 }
 0x18f   :  { %v127_v36 = vmul.f32 %v207_v34, %v124_v31  ;;  %vm133_vm2 = vweird.f32 %v207_v34 }
 0x190   :  { %208 = vrsqrt.f32 %v125_v35  ;;  %vm134_vm4 = vmor %vm132_vm3, %vm133_vm2  ;;  %vm142_vm6 = vweird.f32 %v125_v35 }
 0x191   :  { %v128_v37 = vmul.f32 %v207_v34, %v127_v36 }
 0x193   :  { %v129_v38 = vmul.f32 0.5, %v128_v37 }
 0x195   :  { %v130_v39 = vsub.f32 1.5, %v129_v38 }
 0x196   :  { %v209_v40 = vpop.eup %208 }
 0x197   :  { %v131_v41 = vmul.f32 %v207_v34, %v130_v39  ;;  %v137_v42 = vmul.f32 %v209_v40, %v125_v35  ;;  %vm143_vm5 = vweird.f32 %v209_v40 }
 0x198   :  { %vm144_vm7 = vmor %vm142_vm6, %vm143_vm5 }
 0x199   :  { %v135_v44 = vsel %vm134_vm4, %v207_v34, %v131_v41  ;;  %v138_v45 = vmul.f32 %v209_v40, %v137_v42 }
 0x19a   :  { %v146_v46 = vmul.f32 %v135_v44, %v112_v21 }
 0x19b   :  { %v139_v48 = vmul.f32 0.5, %v138_v45 }
 0x19c   :  { %v151_v49 = vmul.f32 %v202_v43, %v146_v46 }
 0x19d   :  { %v140_v50 = vsub.f32 1.5, %v139_v48 }
 0x19e   :  { %v156_v51 = vadd.f32 %v203_v47, %v151_v49 }
 0x19f   :  { %v141_v52 = vmul.f32 %v209_v40, %v140_v50 }
 0x1a0   :  { %v158_v53 = vmax.f32 %v156_v51, 0.0 }
 0x1a1   :  { %v145_v54 = vsel %vm144_vm7, %v209_v40, %v141_v52 }
 0x1a2   :  { %v147_v55 = vmul.f32 %v145_v54, %v113_v26  ;;  %160 = vst.msk [vmem:[#allocation7] sm:$0xff] %vm77_vm0, %v158_v53 }
 0x1a4   :  { %v152_v56 = vmul.f32 %v202_v43, %v147_v55 }
 0x1a6   :  { %v157_v57 = vadd.f32 %v203_v47, %v152_v56 }
 0x1a8   :  { %v159_v58 = vmax.f32 %v157_v57, 0.0 }
 0x1aa   :  { %161 = vst.msk [vmem:[#allocation7 + $0x8] sm:$0xff] %vm77_vm0, %v159_v58 }
 0x1ab   :  { %174 = dma.vmem_to_hbm [thread:$0]  %s167_s10, 256, %s169_s4, [#allocation4], %s289_s26, %s289_s26, %s290_s27  }
 0x1ac   :  { %286 = dma.done.wait [#allocation4], 256  }
 0x1ad   :  { %287 = vsyncadd [#allocation4], 4294967040 }
 0x1ae   :  { %179 = vsyncpa [#allocation3], 1 }
 0x1af   :  { %180 = vsyncpa [#allocation6], 1 }
 0x1b0   :  { %181 = vsyncpa [#allocation4], 1 }

</bundles_post_ra>
